<compile_context>
chip_gen: v7x
topology: tpu7x:2x2x1
jax: 0.10.0
libtpu: 0.0.40
codegen_flags: <defaults>
</compile_context>

<pallas_src>
import math
from functools import partial

import jax
import jax.numpy as jnp
from jax import lax
from jax.experimental import pallas as pl
from jax.experimental.pallas import tpu as pltpu

BN_EPS = 1e-5


def _round_up(n, m):
    return ((n + m - 1) // m) * m


def _bn_branches(h, G, B_pad, B_valid, D):
    """Training-mode BatchNorm1d (gamma=1, beta=0, biased variance) applied
    independently to each of the G stacked branches of the (G*B_pad, D) slab.
    One-pass form: var = E[h^2] - mean^2.  Padded batch rows (if any) are
    excluded from the statistics."""
    h3 = h.reshape(G, B_pad, D)
    if B_valid != B_pad:
        rows = lax.broadcasted_iota(jnp.int32, (1, B_pad, 1), 1)
        hv = h3 * (rows < B_valid).astype(h3.dtype)
    else:
        hv = h3
    inv_n = 1.0 / float(B_valid)
    mean = jnp.sum(hv, axis=1, keepdims=True) * inv_n
    ex2 = jnp.sum(hv * hv, axis=1, keepdims=True) * inv_n
    var = jnp.maximum(ex2 - mean * mean, 0.0)
    return ((h3 - mean) * lax.rsqrt(var + BN_EPS)).reshape(G * B_pad, D)


def soft_first_kernel(x_ref, mw_ref,
                      w1_ref, b1_ref, w2_ref, b2_ref,
                      wh_ref, bh_ref,
                      flag_ref, head_ref, maskpack_ref,
                      *, b_valid):
    B, D = x_ref.shape          # B = padded batch (multiple of 8)
    C = wh_ref.shape[1]
    P = head_ref.shape[1]       # lane-padded packed head width (multiple of 128)
    G = 3
    w_dt = w1_ref.dtype         # MXU operand dtype (bf16 by default, f32 optional)

    x = x_ref[...]
    mw = mw_ref[...]            # (1, D)
    b1 = b1_ref[...]
    b2 = b2_ref[...]
    bh = bh_ref[...]

    # ---- mask from mask_weight (min/max normalize, sharpened sigmoid) ----
    lo = jnp.min(mw)
    hi = jnp.max(mw)
    inv_range = 1.0 / (hi - lo)   # NOTE: inf/NaN if all entries equal (same as PyTorch reference)
    mask = jax.nn.sigmoid(8.0 * ((mw - lo) * inv_range - 0.5))          # (1, D)
    maskpack_ref[...] = jnp.concatenate([mask, 1.0 - mask], axis=0)     # (2, D)

    # ---- stack the three branch inputs: [x, x - x*mask, x*mask] ----
    xm = x * mask
    stacked = jnp.concatenate([x, x - xm, xm], axis=0)                  # (3B, D)

    # ---- shared backbone: one MXU sweep per layer for all three branches ----
    h = jnp.dot(stacked.astype(w_dt), w1_ref[...],
                preferred_element_type=jnp.float32) + b1
    h = jnp.maximum(h, 0.0)
    h = _bn_branches(h, G, B, b_valid, D)
    h = jnp.dot(h.astype(w_dt), w2_ref[...],
                preferred_element_type=jnp.float32) + b2
    h = jnp.maximum(h, 0.0)
    c = _bn_branches(h, G, B, b_valid, D)                               # (3B, D)

    # branch 3 (x * mask) backbone features -> flag
    flag_ref[...] = c[2 * B:, :]

    # ---- folded head (pred_model @ score_cl collapsed to one matmul), branches 1 & 2 ----
    c12 = c[:2 * B, :]                                                  # (2B, D)
    p = jnp.dot(c12.astype(w_dt), wh_ref[...],
                preferred_element_type=jnp.float32) + bh                # (2B, C)

    pred = p[:B]                 # raw logits -> pred_cluster
    att_logits = p[B:]

    # softmax(pred) -> pseudo_label (and positions 5/6 of the return tuple)
    m = jnp.max(pred, axis=1, keepdims=True)
    e = jnp.exp(pred - m)
    pseudo = e * pl.reciprocal(jnp.sum(e, axis=1, keepdims=True), approx=False)

    pred_att = jax.nn.sigmoid(att_logits)

    # lane-dense packed head output: [pred_cluster | pseudo | pred_att | zero pad]
    parts = [pred, pseudo, pred_att]
    if P > 3 * C:
        parts.append(jnp.zeros((B, P - 3 * C), jnp.float32))
    head_ref[...] = jnp.concatenate(parts, axis=1)                      # (B, P)


def _vmem_ceiling_bytes():
    phys = 128 * 1024 * 1024
    try:
        info = pltpu.get_tpu_info()
        phys = int(getattr(info, "vmem_capacity_bytes", phys))
    except Exception:
        pass
    # Never request near/above physical VMEM (v7x has only 64 MiB); keep headroom.
    return int(min(100 * 1024 * 1024, (phys * 3) // 4))


def soft_first_forward(x, params, *, compute_dtype=jnp.bfloat16):
    """x: (B, D) float32. params: dict of pre-transposed weights/biases.

    compute_dtype controls the dtype of the MXU operands (weights + the
    activations fed to jnp.dot).  Default bfloat16 gives full MXU throughput
    on v6e/v7x; accumulation, BN, softmax and sigmoid stay in float32.
    Use compute_dtype=jnp.float32 for reference-exact numerics.
    """
    B, D = x.shape
    C = params["ws"].shape[1]
    f32 = jnp.float32

    B_pad = _round_up(max(B, 8), 8)     # sublane alignment for reshapes / slices
    P = _round_up(3 * C, 128)           # lane-dense packed head output width

    # Fold pred_model + score_cl (no nonlinearity in between) into a single matmul.
    w_head = jnp.dot(params["wp"].astype(f32), params["ws"].astype(f32))           # (D, C)
    b_head = jnp.dot(params["bp"].astype(f32), params["ws"].astype(f32)) \
             + params["bs"].astype(f32)                                             # (C,)

    x_in = x.astype(f32)
    if B_pad != B:
        x_in = jnp.pad(x_in, ((0, B_pad - B), (0, 0)))

    inputs = (
        x_in,                                              # (B_pad, D)
        params["mask_weight"].reshape(1, D).astype(f32),   # (1, D)
        params["w1"].astype(compute_dtype), params["b1"].reshape(1, D).astype(f32),
        params["w2"].astype(compute_dtype), params["b2"].reshape(1, D).astype(f32),
        w_head.astype(compute_dtype), b_head.reshape(1, C).astype(f32),
    )

    def full_spec(shape):
        # One block covering the whole array; grid is a single point.
        return pl.BlockSpec(shape, lambda i, n=len(shape): (0,) * n)

    in_specs = [full_spec(a.shape) for a in inputs]

    out_shapes = (
        jax.ShapeDtypeStruct((B_pad, D), f32),   # flag
        jax.ShapeDtypeStruct((B_pad, P), f32),   # [pred_cluster | pseudo | pred_att | 0]
        jax.ShapeDtypeStruct((2, D), f32),       # [mask ; 1 - mask]
    )
    out_specs = tuple(full_spec(s.shape) for s in out_shapes)

    # Advisory cost estimate so XLA schedules surrounding ops sensibly.
    flops = 2 * (3 * B_pad * D * D          # gcn1 over the 3 stacked branches
                 + 3 * B_pad * D * D        # gcn2
                 + 2 * B_pad * D * C)       # folded head (branches 1 and 2)
    transcendentals = (B_pad * C            # exp (softmax)
                       + B_pad * C + D      # sigmoids (pred_att, mask)
                       + 6 * D)             # BN rsqrt (2 per branch)
    in_bytes = sum(int(a.size) * a.dtype.itemsize for a in inputs)
    out_bytes = sum(int(math.prod(s.shape)) * 4 for s in out_shapes)
    cost = pl.CostEstimate(flops=int(flops), transcendentals=int(transcendentals),
                           bytes_accessed=int(in_bytes + out_bytes))

    # Generation-aware scoped-VMEM budget (v5e scoped default is only 16 MiB;
    # v7x physical VMEM is 64 MiB so the ceiling stays well under it).
    act_bytes = 8 * (3 * B_pad * D) * 4 + (2 * B_pad * P) * 4
    vmem_limit = int(min(_vmem_ceiling_bytes(),
                         max(32 * 1024 * 1024,
                             8 * (in_bytes + out_bytes + act_bytes))))

    flag, head_pack, mask_pack = pl.pallas_call(
        partial(soft_first_kernel, b_valid=B),
        grid=(1,),
        in_specs=in_specs,
        out_specs=out_specs,
        out_shape=out_shapes,
        compiler_params=pltpu.CompilerParams(
            dimension_semantics=("arbitrary",),
            vmem_limit_bytes=vmem_limit),
        cost_estimate=cost,
    )(*inputs)

    flag = flag[:B]
    pred_cluster = head_pack[:B, :C]
    pseudo = head_pack[:B, C:2 * C]
    pred_att = head_pack[:B, 2 * C:3 * C]
    mask = mask_pack[0]
    a_att = mask_pack[1]

    # PyTorch returns (flag, pred_cluster, pseudo_label, A_att, pred, pred, pred_att, mask)
    # where `pred` was overwritten by torch.softmax, i.e. identical to pseudo_label.
    return (flag, pred_cluster, pseudo, a_att, pseudo, pseudo, pred_att, mask)


def reference_forward(x, params):
    """Pure-JAX f32 reference (unfused head, two-pass BN) matching the PyTorch module."""
    def bn(h):
        mean = jnp.mean(h, axis=0, keepdims=True)
        var = jnp.mean((h - mean) ** 2, axis=0, keepdims=True)   # biased, training-mode
        return (h - mean) * lax.rsqrt(var + BN_EPS)

    def backbone(v):
        h = jnp.maximum(v @ params["w1"] + params["b1"], 0.0)
        h = bn(h)
        h = jnp.maximum(h @ params["w2"] + params["b2"], 0.0)
        return bn(h)

    def head(c):
        return (c @ params["wp"] + params["bp"]) @ params["ws"] + params["bs"]

    mw = params["mask_weight"]
    mask = jax.nn.sigmoid(8.0 * ((mw - jnp.min(mw)) / (jnp.max(mw) - jnp.min(mw)) - 0.5))
    c1 = backbone(x)
    pred_cluster = head(c1)
    pseudo = jax.nn.softmax(pred_cluster, axis=1)
    c2 = backbone(x - x * mask)
    pred_att = jax.nn.sigmoid(head(c2))
    flag = backbone(x * mask)
    return (flag, pred_cluster, pseudo, 1.0 - mask, pseudo, pseudo, pred_att, mask)


def init_params(key, input_shape, n_class):
    D = input_shape
    D2 = input_shape // 2
    C = n_class
    ks = jax.random.split(key, 9)
    f32 = jnp.float32

    def lin(kw, kb, fan_in, fan_out):
        bound = 1.0 / jnp.sqrt(fan_in)
        w = jax.random.uniform(kw, (fan_in, fan_out), f32, -bound, bound)
        b = jax.random.uniform(kb, (fan_out,), f32, -bound, bound)
        return w, b

    params = {}
    params["mask_weight"] = 0.01 * jax.random.normal(ks[0], (D,), f32)
    params["w1"], params["b1"] = lin(ks[1], ks[2], D, D)     # gcn1
    params["w2"], params["b2"] = lin(ks[3], ks[4], D, D)     # gcn2
    params["wp"], params["bp"] = lin(ks[5], ks[6], D, D2)    # pred_model
    params["ws"], params["bs"] = lin(ks[7], ks[8], D2, C)    # score_cl
    return params


if __name__ == "__main__":
    B = 8            # batch (>=2 so BatchNorm batch statistics are meaningful)
    D = 32           # input_shape
    C = 4            # nClass

    key = jax.random.PRNGKey(0)
    kx, kp = jax.random.split(key)
    x = jax.random.normal(kx, (B, D), jnp.float32)
    params = init_params(kp, D, C)

    # --- f32 compute path: validate against the pure-JAX reference ---
    outs_f32 = jax.block_until_ready(soft_first_forward(x, params, compute_dtype=jnp.float32))
    ref = jax.block_until_ready(reference_forward(x, params))
    for got, want in zip(outs_f32, ref):
        assert got.shape == want.shape, (got.shape, want.shape)
        assert jnp.allclose(got, want, atol=1e-3, rtol=1e-3), \
            float(jnp.max(jnp.abs(got - want)))

    # --- default path (bf16 MXU operands, f32 accumulation): sanity checks ---
    outs = jax.block_until_ready(soft_first_forward(x, params))
    flag, pred_cluster, pseudo, a_att, pred1, pred2, pred_att, mask = outs
    assert flag.shape == (B, D)
    assert pred_cluster.shape == (B, C)
    assert pseudo.shape == (B, C)
    assert a_att.shape == (D,)
    assert pred1.shape == (B, C) and pred2.shape == (B, C)
    assert pred_att.shape == (B, C)
    assert mask.shape == (D,)

    # Numerical sanity: softmax rows sum to 1, sigmoid/mask bounded, A_att = 1 - mask.
    assert jnp.allclose(jnp.sum(pseudo, axis=1), 1.0, atol=1e-5)
    assert bool(jnp.all((pred_att > 0.0) & (pred_att < 1.0)))
    assert jnp.allclose(a_att, 1.0 - mask, atol=1e-6)

    print("KERNEL_OK")
</pallas_src>

<mosaic_0001>
module attributes {stable_mosaic.version = 11 : i64} {
  func.func @soft_first_kernel(%arg0: i32, %arg1: memref<8x32xf32, #tpu.memory_space<vmem>>, %arg2: memref<1x32xf32, #tpu.memory_space<vmem>>, %arg3: memref<32x32xf32, #tpu.memory_space<vmem>>, %arg4: memref<1x32xf32, #tpu.memory_space<vmem>>, %arg5: memref<32x32xf32, #tpu.memory_space<vmem>>, %arg6: memref<1x32xf32, #tpu.memory_space<vmem>>, %arg7: memref<32x4xf32, #tpu.memory_space<vmem>>, %arg8: memref<1x4xf32, #tpu.memory_space<vmem>>, %arg9: memref<8x32xf32, #tpu.memory_space<vmem>>, %arg10: memref<8x128xf32, #tpu.memory_space<vmem>>, %arg11: memref<2x32xf32, #tpu.memory_space<vmem>>) attributes {dimension_semantics = [#tpu.dimension_semantics<arbitrary>], iteration_bounds = array<i64: 1>, scalar_prefetch = 0 : i64, scratch_operands = 0 : i64, tpu.core_type = #tpu.core_type<tc>, window_params = [{pipeline_mode = #tpu.pipeline_mode<synchronous>, transform_indices = @transform_0, window_bounds = array<i64: 8, 32>}, {pipeline_mode = #tpu.pipeline_mode<synchronous>, transform_indices = @transform_1, window_bounds = array<i64: 1, 32>}, {pipeline_mode = #tpu.pipeline_mode<synchronous>, transform_indices = @transform_2, window_bounds = array<i64: 32, 32>}, {pipeline_mode = #tpu.pipeline_mode<synchronous>, transform_indices = @transform_3, window_bounds = array<i64: 1, 32>}, {pipeline_mode = #tpu.pipeline_mode<synchronous>, transform_indices = @transform_4, window_bounds = array<i64: 32, 32>}, {pipeline_mode = #tpu.pipeline_mode<synchronous>, transform_indices = @transform_5, window_bounds = array<i64: 1, 32>}, {pipeline_mode = #tpu.pipeline_mode<synchronous>, transform_indices = @transform_6, window_bounds = array<i64: 32, 4>}, {pipeline_mode = #tpu.pipeline_mode<synchronous>, transform_indices = @transform_7, window_bounds = array<i64: 1, 4>}, {pipeline_mode = #tpu.pipeline_mode<synchronous>, transform_indices = @transform_8, window_bounds = array<i64: 8, 32>}, {pipeline_mode = #tpu.pipeline_mode<synchronous>, transform_indices = @transform_9, window_bounds = array<i64: 8, 128>}, {pipeline_mode = #tpu.pipeline_mode<synchronous>, transform_indices = @transform_10, window_bounds = array<i64: 2, 32>}]} {
    %c0 = arith.constant 0 : index
    %c0_0 = arith.constant 0 : index
    %0 = vector.load %arg1[%c0, %c0_0] : memref<8x32xf32, #tpu.memory_space<vmem>>, vector<8x32xf32>
    %c0_1 = arith.constant 0 : index
    %c0_2 = arith.constant 0 : index
    %1 = vector.load %arg2[%c0_1, %c0_2] : memref<1x32xf32, #tpu.memory_space<vmem>>, vector<1x32xf32>
    %c0_3 = arith.constant 0 : index
    %c0_4 = arith.constant 0 : index
    %2 = vector.load %arg4[%c0_3, %c0_4] : memref<1x32xf32, #tpu.memory_space<vmem>>, vector<1x32xf32>
    %c0_5 = arith.constant 0 : index
    %c0_6 = arith.constant 0 : index
    %3 = vector.load %arg6[%c0_5, %c0_6] : memref<1x32xf32, #tpu.memory_space<vmem>>, vector<1x32xf32>
    %c0_7 = arith.constant 0 : index
    %c0_8 = arith.constant 0 : index
    %4 = vector.load %arg8[%c0_7, %c0_8] : memref<1x4xf32, #tpu.memory_space<vmem>>, vector<1x4xf32>
    %5 = vector.shape_cast %1 : vector<1x32xf32> to vector<1x1x32xf32>
    %cst = arith.constant dense<0x7F800000> : vector<1xf32>
    %6 = vector.multi_reduction <minimumf>, %5, %cst [1, 2] : vector<1x1x32xf32> to vector<1xf32>
    %7 = vector.shape_cast %6 : vector<1xf32> to vector<1x1x1xf32>
    %8 = vector.extract %7[0, 0, 0] : f32 from vector<1x1x1xf32>
    %9 = vector.shape_cast %1 : vector<1x32xf32> to vector<1x1x32xf32>
    %cst_9 = arith.constant dense<0xFF800000> : vector<1xf32>
    %10 = vector.multi_reduction <maximumf>, %9, %cst_9 [1, 2] : vector<1x1x32xf32> to vector<1xf32>
    %11 = vector.shape_cast %10 : vector<1xf32> to vector<1x1x1xf32>
    %12 = vector.extract %11[0, 0, 0] : f32 from vector<1x1x1xf32>
    %13 = arith.subf %12, %8 : f32
    %cst_10 = arith.constant 1.000000e+00 : f32
    %14 = arith.divf %cst_10, %13 : f32
    %15 = vector.broadcast %8 : f32 to vector<1x32xf32>
    %16 = arith.subf %1, %15 : vector<1x32xf32>
    %17 = vector.broadcast %14 : f32 to vector<1x32xf32>
    %18 = arith.mulf %16, %17 : vector<1x32xf32>
    %cst_11 = arith.constant 5.000000e-01 : f32
    %19 = vector.broadcast %cst_11 : f32 to vector<1x32xf32>
    %20 = arith.subf %18, %19 : vector<1x32xf32>
    %cst_12 = arith.constant 8.000000e+00 : f32
    %21 = vector.broadcast %cst_12 : f32 to vector<1x32xf32>
    %22 = arith.mulf %21, %20 : vector<1x32xf32>
    %23 = arith.negf %22 : vector<1x32xf32>
    %24 = math.exp %23 : vector<1x32xf32>
    %cst_13 = arith.constant 1.000000e+00 : f32
    %25 = vector.broadcast %cst_13 : f32 to vector<1x32xf32>
    %26 = arith.addf %25, %24 : vector<1x32xf32>
    %27 = arith.divf %25, %26 : vector<1x32xf32>
    %cst_14 = arith.constant 1.000000e+00 : f32
    %28 = vector.broadcast %cst_14 : f32 to vector<1x32xf32>
    %29 = arith.subf %28, %27 : vector<1x32xf32>
    %30 = tpu.concatenate %27, %29 in 0 : vector<1x32xf32>, vector<1x32xf32> -> vector<2x32xf32>
    %c0_15 = arith.constant 0 : index
    %c0_16 = arith.constant 0 : index
    %31 = vector.load %arg11[%c0_15, %c0_16] : memref<2x32xf32, #tpu.memory_space<vmem>>, vector<2x32xf32>
    tpu.vector_store %arg11[%c0_15, %c0_16], %30 {strides = array<i32>} : memref<2x32xf32, #tpu.memory_space<vmem>>, vector<2x32xf32>,
    %32 = vector.broadcast %27 : vector<1x32xf32> to vector<8x32xf32>
    %33 = arith.mulf %0, %32 : vector<8x32xf32>
    %34 = arith.subf %0, %33 : vector<8x32xf32>
    %35 = tpu.concatenate %0, %34, %33 in 0 : vector<8x32xf32>, vector<8x32xf32>, vector<8x32xf32> -> vector<24x32xf32>
    %c0_17 = arith.constant 0 : index
    %c0_18 = arith.constant 0 : index
    %36 = vector.load %arg3[%c0_17, %c0_18] : memref<32x32xf32, #tpu.memory_space<vmem>>, vector<32x32xf32>
    %cst_19 = arith.constant dense<0.000000e+00> : vector<24x32xf32>
    %37 = tpu.matmul %35, %36, %cst_19 {dimension_numbers = #tpu.dot_dimension_numbers<[1], [0], [0], [1], [0, 0, 1, 1], [], []>} : vector<24x32xf32>, vector<32x32xf32>, vector<24x32xf32> -> vector<24x32xf32>
    %38 = vector.broadcast %2 : vector<1x32xf32> to vector<24x32xf32>
    %39 = arith.addf %37, %38 : vector<24x32xf32>
    %cst_20 = arith.constant 0.000000e+00 : f32
    %40 = vector.broadcast %cst_20 : f32 to vector<24x32xf32>
    %41 = arith.maximumf %39, %40 : vector<24x32xf32>
    %42 = vector.shape_cast %41 : vector<24x32xf32> to vector<3x8x32xf32>
    %cst_21 = arith.constant dense<0.000000e+00> : vector<3x32xf32>
    %43 = vector.multi_reduction <add>, %42, %cst_21 [1] : vector<3x8x32xf32> to vector<3x32xf32>
    %44 = vector.shape_cast %43 : vector<3x32xf32> to vector<3x1x32xf32>
    %cst_22 = arith.constant 1.250000e-01 : f32
    %45 = vector.broadcast %cst_22 : f32 to vector<3x1x32xf32>
    %46 = arith.mulf %44, %45 : vector<3x1x32xf32>
    %47 = arith.mulf %42, %42 : vector<3x8x32xf32>
    %cst_23 = arith.constant dense<0.000000e+00> : vector<3x32xf32>
    %48 = vector.multi_reduction <add>, %47, %cst_23 [1] : vector<3x8x32xf32> to vector<3x32xf32>
    %49 = vector.shape_cast %48 : vector<3x32xf32> to vector<3x1x32xf32>
    %cst_24 = arith.constant 1.250000e-01 : f32
    %50 = vector.broadcast %cst_24 : f32 to vector<3x1x32xf32>
    %51 = arith.mulf %49, %50 : vector<3x1x32xf32>
    %52 = arith.mulf %46, %46 : vector<3x1x32xf32>
    %53 = arith.subf %51, %52 : vector<3x1x32xf32>
    %cst_25 = arith.constant 0.000000e+00 : f32
    %54 = vector.broadcast %cst_25 : f32 to vector<3x1x32xf32>
    %55 = arith.maximumf %53, %54 : vector<3x1x32xf32>
    %56 = vector.broadcast %46 : vector<3x1x32xf32> to vector<3x8x32xf32>
    %57 = arith.subf %42, %56 : vector<3x8x32xf32>
    %cst_26 = arith.constant 9.99999974E-6 : f32
    %58 = vector.broadcast %cst_26 : f32 to vector<3x1x32xf32>
    %59 = arith.addf %55, %58 : vector<3x1x32xf32>
    %60 = math.rsqrt %59 : vector<3x1x32xf32>
    %61 = vector.broadcast %60 : vector<3x1x32xf32> to vector<3x8x32xf32>
    %62 = arith.mulf %57, %61 : vector<3x8x32xf32>
    %63 = vector.shape_cast %62 : vector<3x8x32xf32> to vector<24x32xf32>
    %c0_27 = arith.constant 0 : index
    %c0_28 = arith.constant 0 : index
    %64 = vector.load %arg5[%c0_27, %c0_28] : memref<32x32xf32, #tpu.memory_space<vmem>>, vector<32x32xf32>
    %cst_29 = arith.constant dense<0.000000e+00> : vector<24x32xf32>
    %65 = tpu.matmul %63, %64, %cst_29 {dimension_numbers = #tpu.dot_dimension_numbers<[1], [0], [0], [1], [0, 0, 1, 1], [], []>} : vector<24x32xf32>, vector<32x32xf32>, vector<24x32xf32> -> vector<24x32xf32>
    %66 = vector.broadcast %3 : vector<1x32xf32> to vector<24x32xf32>
    %67 = arith.addf %65, %66 : vector<24x32xf32>
    %cst_30 = arith.constant 0.000000e+00 : f32
    %68 = vector.broadcast %cst_30 : f32 to vector<24x32xf32>
    %69 = arith.maximumf %67, %68 : vector<24x32xf32>
    %70 = vector.shape_cast %69 : vector<24x32xf32> to vector<3x8x32xf32>
    %cst_31 = arith.constant dense<0.000000e+00> : vector<3x32xf32>
    %71 = vector.multi_reduction <add>, %70, %cst_31 [1] : vector<3x8x32xf32> to vector<3x32xf32>
    %72 = vector.shape_cast %71 : vector<3x32xf32> to vector<3x1x32xf32>
    %cst_32 = arith.constant 1.250000e-01 : f32
    %73 = vector.broadcast %cst_32 : f32 to vector<3x1x32xf32>
    %74 = arith.mulf %72, %73 : vector<3x1x32xf32>
    %75 = arith.mulf %70, %70 : vector<3x8x32xf32>
    %cst_33 = arith.constant dense<0.000000e+00> : vector<3x32xf32>
    %76 = vector.multi_reduction <add>, %75, %cst_33 [1] : vector<3x8x32xf32> to vector<3x32xf32>
    %77 = vector.shape_cast %76 : vector<3x32xf32> to vector<3x1x32xf32>
    %cst_34 = arith.constant 1.250000e-01 : f32
    %78 = vector.broadcast %cst_34 : f32 to vector<3x1x32xf32>
    %79 = arith.mulf %77, %78 : vector<3x1x32xf32>
    %80 = arith.mulf %74, %74 : vector<3x1x32xf32>
    %81 = arith.subf %79, %80 : vector<3x1x32xf32>
    %cst_35 = arith.constant 0.000000e+00 : f32
    %82 = vector.broadcast %cst_35 : f32 to vector<3x1x32xf32>
    %83 = arith.maximumf %81, %82 : vector<3x1x32xf32>
    %84 = vector.broadcast %74 : vector<3x1x32xf32> to vector<3x8x32xf32>
    %85 = arith.subf %70, %84 : vector<3x8x32xf32>
    %cst_36 = arith.constant 9.99999974E-6 : f32
    %86 = vector.broadcast %cst_36 : f32 to vector<3x1x32xf32>
    %87 = arith.addf %83, %86 : vector<3x1x32xf32>
    %88 = math.rsqrt %87 : vector<3x1x32xf32>
    %89 = vector.broadcast %88 : vector<3x1x32xf32> to vector<3x8x32xf32>
    %90 = arith.mulf %85, %89 : vector<3x8x32xf32>
    %91 = vector.shape_cast %90 : vector<3x8x32xf32> to vector<24x32xf32>
    %92 = vector.extract_strided_slice %91 {offsets = [16, 0], sizes = [8, 32], strides = [1, 1]} : vector<24x32xf32> to vector<8x32xf32>
    %c0_37 = arith.constant 0 : index
    %c0_38 = arith.constant 0 : index
    %93 = vector.load %arg9[%c0_37, %c0_38] : memref<8x32xf32, #tpu.memory_space<vmem>>, vector<8x32xf32>
    tpu.vector_store %arg9[%c0_37, %c0_38], %92 {strides = array<i32>} : memref<8x32xf32, #tpu.memory_space<vmem>>, vector<8x32xf32>,
    %94 = vector.extract_strided_slice %91 {offsets = [0, 0], sizes = [16, 32], strides = [1, 1]} : vector<24x32xf32> to vector<16x32xf32>
    %c0_39 = arith.constant 0 : index
    %c0_40 = arith.constant 0 : index
    %95 = vector.load %arg7[%c0_39, %c0_40] : memref<32x4xf32, #tpu.memory_space<vmem>>, vector<32x4xf32>
    %cst_41 = arith.constant dense<0.000000e+00> : vector<16x4xf32>
    %96 = tpu.matmul %94, %95, %cst_41 {dimension_numbers = #tpu.dot_dimension_numbers<[1], [0], [0], [1], [0, 0, 1, 1], [], []>} : vector<16x32xf32>, vector<32x4xf32>, vector<16x4xf32> -> vector<16x4xf32>
    %97 = vector.broadcast %4 : vector<1x4xf32> to vector<16x4xf32>
    %98 = arith.addf %96, %97 : vector<16x4xf32>
    %99 = vector.extract_strided_slice %98 {offsets = [0, 0], sizes = [8, 4], strides = [1, 1]} : vector<16x4xf32> to vector<8x4xf32>
    %100 = vector.extract_strided_slice %98 {offsets = [8, 0], sizes = [8, 4], strides = [1, 1]} : vector<16x4xf32> to vector<8x4xf32>
    %cst_42 = arith.constant dense<0xFF800000> : vector<8xf32>
    %101 = vector.multi_reduction <maximumf>, %99, %cst_42 [1] : vector<8x4xf32> to vector<8xf32>
    %102 = vector.shape_cast %101 : vector<8xf32> to vector<8x1xf32>
    %103 = vector.broadcast %102 : vector<8x1xf32> to vector<8x4xf32>
    %104 = arith.subf %99, %103 : vector<8x4xf32>
    %105 = math.exp %104 : vector<8x4xf32>
    %cst_43 = arith.constant dense<0.000000e+00> : vector<8xf32>
    %106 = vector.multi_reduction <add>, %105, %cst_43 [1] : vector<8x4xf32> to vector<8xf32>
    %107 = vector.shape_cast %106 : vector<8xf32> to vector<8x1xf32>
    %108 = tpu.reciprocal %107 : vector<8x1xf32> -> vector<8x1xf32>
    %109 = vector.broadcast %108 : vector<8x1xf32> to vector<8x4xf32>
    %110 = arith.mulf %105, %109 : vector<8x4xf32>
    %111 = arith.negf %100 : vector<8x4xf32>
    %112 = math.exp %111 : vector<8x4xf32>
    %cst_44 = arith.constant 1.000000e+00 : f32
    %113 = vector.broadcast %cst_44 : f32 to vector<8x4xf32>
    %114 = arith.addf %113, %112 : vector<8x4xf32>
    %115 = arith.divf %113, %114 : vector<8x4xf32>
    %cst_45 = arith.constant 0.000000e+00 : f32
    %116 = vector.broadcast %cst_45 : f32 to vector<8x116xf32>
    %117 = tpu.concatenate %99, %110, %115, %116 in 1 : vector<8x4xf32>, vector<8x4xf32>, vector<8x4xf32>, vector<8x116xf32> -> vector<8x128xf32>
    %c0_46 = arith.constant 0 : index
    %c0_47 = arith.constant 0 : index
    %118 = vector.load %arg10[%c0_46, %c0_47] : memref<8x128xf32, #tpu.memory_space<vmem>>, vector<8x128xf32>
    tpu.vector_store %arg10[%c0_46, %c0_47], %117 {strides = array<i32>} : memref<8x128xf32, #tpu.memory_space<vmem>>, vector<8x128xf32>,
    return
  }
  func.func @transform_0(%arg0: i32) -> (i32, i32) {
    %c0_i32 = arith.constant 0 : i32
    %c0_i32_0 = arith.constant 0 : i32
    %c0_i32_1 = arith.constant 0 : i32
    return %c0_i32, %c0_i32_0 : i32, i32
  }
  func.func @transform_1(%arg0: i32) -> (i32, i32) {
    %c0_i32 = arith.constant 0 : i32
    %c0_i32_0 = arith.constant 0 : i32
    %c0_i32_1 = arith.constant 0 : i32
    return %c0_i32, %c0_i32_0 : i32, i32
  }
  func.func @transform_2(%arg0: i32) -> (i32, i32) {
    %c0_i32 = arith.constant 0 : i32
    %c0_i32_0 = arith.constant 0 : i32
    %c0_i32_1 = arith.constant 0 : i32
    return %c0_i32, %c0_i32_0 : i32, i32
  }
  func.func @transform_3(%arg0: i32) -> (i32, i32) {
    %c0_i32 = arith.constant 0 : i32
    %c0_i32_0 = arith.constant 0 : i32
    %c0_i32_1 = arith.constant 0 : i32
    return %c0_i32, %c0_i32_0 : i32, i32
  }
  func.func @transform_4(%arg0: i32) -> (i32, i32) {
    %c0_i32 = arith.constant 0 : i32
    %c0_i32_0 = arith.constant 0 : i32
    %c0_i32_1 = arith.constant 0 : i32
    return %c0_i32, %c0_i32_0 : i32, i32
  }
  func.func @transform_5(%arg0: i32) -> (i32, i32) {
    %c0_i32 = arith.constant 0 : i32
    %c0_i32_0 = arith.constant 0 : i32
    %c0_i32_1 = arith.constant 0 : i32
    return %c0_i32, %c0_i32_0 : i32, i32
  }
  func.func @transform_6(%arg0: i32) -> (i32, i32) {
    %c0_i32 = arith.constant 0 : i32
    %c0_i32_0 = arith.constant 0 : i32
    %c0_i32_1 = arith.constant 0 : i32
    return %c0_i32, %c0_i32_0 : i32, i32
  }
  func.func @transform_7(%arg0: i32) -> (i32, i32) {
    %c0_i32 = arith.constant 0 : i32
    %c0_i32_0 = arith.constant 0 : i32
    %c0_i32_1 = arith.constant 0 : i32
    return %c0_i32, %c0_i32_0 : i32, i32
  }
  func.func @transform_8(%arg0: i32) -> (i32, i32) {
    %c0_i32 = arith.constant 0 : i32
    %c0_i32_0 = arith.constant 0 : i32
    %c0_i32_1 = arith.constant 0 : i32
    return %c0_i32, %c0_i32_0 : i32, i32
  }
  func.func @transform_9(%arg0: i32) -> (i32, i32) {
    %c0_i32 = arith.constant 0 : i32
    %c0_i32_0 = arith.constant 0 : i32
    %c0_i32_1 = arith.constant 0 : i32
    return %c0_i32, %c0_i32_0 : i32, i32
  }
  func.func @transform_10(%arg0: i32) -> (i32, i32) {
    %c0_i32 = arith.constant 0 : i32
    %c0_i32_0 = arith.constant 0 : i32
    %c0_i32_1 = arith.constant 0 : i32
    return %c0_i32, %c0_i32_0 : i32, i32
  }
}

</mosaic_0001>

<bundles_post_ra>
// kernel: tpu_custom_call.1
= control target key start
LH: loop header
LB: loop body
LE: loop exit
PB: predicated region body
PF: predicated region fallthrough
CT: control target
= control target key end

     0   :  { %16 = vsyncpa [#allocation3], 0  ;;  %s1049_s0 = inlined_call_operand.vmem [shape: f32[8,32], index: 0, kind: input, shape index: {}]   ;;  %s1050_s1 = inlined_call_operand.vmem [shape: f32[1,32], index: 1, kind: input, shape index: {}]   ;;  %s1051_s2 = inlined_call_operand.vmem [shape: f32[32,32], index: 2, kind: input, shape index: {}]   ;;  %s1052_s3 = inlined_call_operand.vmem [shape: f32[1,32], index: 3, kind: input, shape index: {}]   ;;  %s1053_s4 = inlined_call_operand.hbm [shape: f32[32,32], index: 4, kind: input, shape index: {}]   ;;  %s1054_s5 = inlined_call_operand.vmem [shape: f32[1,32], index: 5, kind: input, shape index: {}]   ;;  %s1055_s6 = inlined_call_operand.vmem [shape: f32[32,4], index: 6, kind: input, shape index: {}]   ;;  %s1056_s7 = inlined_call_operand.vmem [shape: f32[1,4], index: 7, kind: input, shape index: {}]   ;;  %s1057_s8 = inlined_call_operand.hbm [shape: f32[8,32], index: 8, kind: output, shape index: {0}]   ;;  %s1058_s9 = inlined_call_operand.hbm [shape: f32[8,128], index: 9, kind: output, shape index: {1}]   ;;  %s1059_s10 = inlined_call_operand.hbm [shape: f32[2,32], index: 10, kind: output, shape index: {2}]  }
   0x1   :  { %17 = vsyncpa [#allocation4], 0 }
   0x2   :  { %18 = vsyncpa [#allocation7], 0  ;;  %s859_s13 = smov [#allocation2]   ;;  %s765_s17 = scalar_lea.hbm %s1053_s4, 512 }
   0x3   :  { %s32_s14 = sshll.u32 %s859_s13, 4  ;;  %p766_p0 = scmp.ne.s32.totalorder %s1053_s4, %s765_s17  ;;  %s33_s14 = int_to_ptr.vmem [resolvable:$true] %s32_s14 }
   0x4   :  { %p769_p1 = scmp.lt.u32.totalorder %s765_s17, %s1053_s4 }
   0x6   :  { %p771_p2 = pnand %p769_p1, %p766_p0 }
   0x8   :  { %774 = shalt.err (!%p771_p2)
}
   0x9   :  { %s775_s22 = scalar_lea.vmem %s33_s14, 512  ;;  %p780_p4 = scmp.lt.s32.totalorder %s33_s14, %s33_s14 }
   0xa   :  { %p776_p3 = scmp.ne.s32.totalorder %s33_s14, %s775_s22  ;;  %p781_p5 = scmp.lt.s32.totalorder %s775_s22, %s775_s22 }
   0xc   :  { %p782_p6 = por %p781_p5, %p780_p4 }
   0xe   :  { %p783_p7 = pnand %p782_p6, %p776_p3 }
  0x10   :  { %786 = shalt.err (!%p783_p7)
}
  0x11   :  { %s860_s23 = smov 128   ;;  %s861_s24 = smov 8  }
  0x12   :  { %38 = dma.hbm_to_vmem [thread:$0]  %s1053_s4, 512, %s33_s14, [#allocation3], %s860_s23, %s860_s23, %s861_s24  }
  0x13   :  { %853 = dma.done.wait [#allocation3], 512  }
  0x14   :  { %854 = vsyncadd [#allocation3], 4294966784  ;;  %vm53_vm0 = vcmask 253952   ;;  %v49_v0 = vld [vmem:[%s1050_s1] sm:$0x1]  ;;  %v110_v4 = vld [vmem:[%s1051_s2 + $0x8] sm:$0xff]  ;;  %v92_v43 = vlaneseq }
  0x15   :  { %v54_v1 = vsel %vm53_vm0, %v49_v0, inf  ;;  %v64_v2 = vsel %vm53_vm0, %v49_v0, -inf  ;;  %v109_v3 = vld [vmem:[%s1051_s2] sm:$0xff]  ;;  %v111_v5 = vld [vmem:[%s1051_s2 + $0x10] sm:$0xff]  ;;  %v862_v6 = vmov 0.0|0.0   ;;  %v112_v8 = vld [vmem:[%s1051_s2 + $0x18] sm:$0xff] }
  0x16   :  { %55 = vmin.xlane.f32.xlu0 %v54_v1  ;;  %703 = vmatprep.subr.bf16.mxu0 %v862_v6  ;;  %v704_v7 = vpack.c.bf16 %v110_v4, %v109_v3  ;;  %vm863_vm1 = vmmov 0   ;;  %v864_v9 = vmov 0.0   ;;  %v707_v10 = vpack.c.bf16 %v112_v8, %v111_v5  ;;  %v48_v11 = vld [vmem:[%s1049_s0] sm:$0xff]  ;;  %v285_v28 = vld [vmem:[#allocation2 + $0x8] sm:$0xff]  ;;  %v286_v29 = vld [vmem:[#allocation2 + $0x10] sm:$0xff] }
  0x17   :  { %666 = vmatprep.mubr.msk.f32.mxu0 %vm863_vm1, %v864_v9  ;;  %709 = vmatprep.subr.bf16.mxu1 %v862_v6  ;;  %vm119_vm2 = vcmask 261120   ;;  %v284_v27 = vld [vmem:[#allocation2] sm:$0xff]  ;;  %v287_v31 = vld [vmem:[#allocation2 + $0x18] sm:$0xff]  ;;  %v93_v44 = vshrl.u32 %v92_v43, 7  ;;  %vm97_vm3 = vcmask 1040384   ;;  %vm99_vm4 = vcmask 254976  }
  0x18   :  { %683 = vmatprep.mubr.msk.f32.mxu1 %vm863_vm1, %v864_v9  ;;  %705 = vmatpush3.bf16.msra.mxu0 %v704_v7  ;;  %v710_v30 = vpack.c.bf16 %v285_v28, %v284_v27  ;;  %v713_v32 = vpack.c.bf16 %v287_v31, %v286_v29  ;;  %v626_v53 = vld [vmem:[%s1052_s3] ss:$0 sm:$0xff]  ;;  %vm550_vm5 = vcmask 31744  }
  0x19   :  { %706 = vmatprep.subr.bf16.mxu0 %v862_v6  ;;  %v94_v45 = vsub.s32 0, %v93_v44 }
  0x1a   :  { %65 = vmax.xlane.f32.xlu0 %v64_v2  ;;  %711 = vmatpush3.bf16.msra.mxu1 %v710_v30 }
  0x1b   :  { %712 = vmatprep.subr.bf16.mxu1 %v862_v6 }
  0x1c   :  { %708 = vmatpush3.bf16.msra.mxu0 %v707_v10 }
  0x1e   :  { %714 = vmatpush3.bf16.msra.mxu1 %v713_v32 }
  0x1f   :  { %667 = vmatmul.mubr.msk.f32.vlgmr.msra.gmra.mrb[0].mxu0 %vm119_vm2, %v48_v11 }
  0x20   :  { %669 = vmatprep.mubr.msk.f32.mxu0 %vm863_vm1, %v864_v9 }
  0xa3   :  { %v56_v12 = vpop.xlane.xlu0 %55 }
  0xa4   :  { %v57_v13 = vrot.slane %v56_v12, 4 }
  0xa6   :  { %v58_v14 = vmin.f32 %v56_v12, %v57_v13 }
  0xa7   :  { %v66_v15 = vpop.xlane.xlu0 %65 }
  0xa8   :  { %v59_v16 = vrot.slane %v58_v14, 2  ;;  %v67_v17 = vrot.slane %v66_v15, 4 }
  0xaa   :  { %v68_v18 = vmax.f32 %v66_v15, %v67_v17  ;;  %v60_v19 = vmin.f32 %v58_v14, %v59_v16 }
  0xac   :  { %v69_v20 = vrot.slane %v68_v18, 2  ;;  %v61_v21 = vrot.slane %v60_v19, 1 }
  0xae   :  { %v62_v22 = vmin.f32 %v60_v19, %v61_v21  ;;  %v70_v23 = vmax.f32 %v68_v18, %v69_v20 }
  0xb0   :  { %723 = vpush %v62_v22  ;;  %v71_v24 = vrot.slane %v70_v23, 1 }
  0xb2   :  { %v72_v25 = vmax.f32 %v70_v23, %v71_v24 }
  0xb4   :  { %725 = vpush %v72_v25 }
  0xe1   :  { %s724_s0 = spop %723 }
  0xe2   :  { %v78_v34 = vstv %s724_s0 }
  0xe3   :  { %v79_v35 = vsub.f32 %v49_v0, %v78_v34 }
  0xe5   :  { %s726_s2 = spop %725 }
  0xe6   :  { %s74_s17 = ssub.f32 %s726_s2, %s724_s0 }
  0xe8   :  { %v75_v26 = vstv %s74_s17 }
  0xe9   :  { %739 = vrcp.f32 %v75_v26 }
  0xf2   :  { %v195_v54 = vpop.f32.mrb[0].mxu0 }
  0xf3   :  { %v740_v33 = vpop.eup %739  ;;  %v196_v55 = vadd.f32 %v626_v53, %v195_v54  ;;  %v668_v56 = vpop.f32.mrb[1].mxu0 }
  0xf4   :  { %727 = vpush %v740_v33 }
  0xf5   :  { %v209_v57 = vmax.f32 %v196_v55, 0.0 }
  0xf7   :  { %v212_v58 = vsel %vm119_vm2, %v209_v57, 0.0  ;;  %v236_v59 = vmul.f32 %v209_v57, %v209_v57 }
  0xf8   :  { %v213_v60 = vrot.slane %v212_v58, 4 }
  0xf9   :  { %v239_v61 = vsel %vm119_vm2, %v236_v59, 0.0 }
  0xfa   :  { %v214_v62 = vadd.f32 %v213_v60, %v212_v58  ;;  %v240_v63 = vrot.slane %v239_v61, 4 }
  0xfc   :  { %v215_v0 = vrot.slane %v214_v62, 2  ;;  %v241_v1 = vadd.f32 %v240_v63, %v239_v61 }
  0xfe   :  { %v216_v2 = vadd.f32 %v215_v0, %v214_v62  ;;  %v242_v3 = vrot.slane %v241_v1, 2 }
 0x100   :  { %v217_v4 = vrot.slane %v216_v2, 1  ;;  %v243_v5 = vadd.f32 %v242_v3, %v241_v1 }
 0x102   :  { %v218_v6 = vadd.f32 %v217_v4, %v216_v2  ;;  %v244_v7 = vrot.slane %v243_v5, 1 }
 0x104   :  { %v233_v8 = vmul.f32 0.125, %v218_v6  ;;  %v245_v10 = vadd.f32 %v244_v7, %v243_v5 }
 0x106   :  { %v263_v12 = vmul.f32 %v233_v8, %v233_v8  ;;  %v272_v16 = vsub.f32 %v209_v57, %v233_v8 }
 0x125   :  { %s728_s18 = spop %727 }
 0x126   :  { %v80_v36 = vstv %s728_s18 }
 0x127   :  { %v81_v37 = vmul.f32 %v80_v36, %v79_v35 }
 0x129   :  { %v624_v38 = vadd.f32 -0.5, %v81_v37 }
 0x12b   :  { %v625_v39 = vmul.f32 -8.0, %v624_v38 }
 0x12d   :  { %v85_v40 = vmul.f32 1.442695, %v625_v39 }
 0x12f   :  { %741 = vpow2.f32 %v85_v40 }
 0x139   :  { %v742_v41 = vpop.eup %741 }
 0x13a   :  { %v87_v42 = vadd.f32 1.0, %v742_v41 }
 0x13c   :  { %743 = vrcp.f32 %v87_v42 }
 0x146   :  { %v744_v46 = vpop.eup %743 }
 0x147   :  { %v105_v47 = vrot.slane %v744_v46, %v94_v45  ;;  %v90_v48 = vsub.f32 1.0, %v744_v46 }
 0x149   :  { %v107_v49 = vmul.f32 %v105_v47, %v48_v11  ;;  %v95_v50 = vrot.slane %v90_v48, %v94_v45 }
 0x14b   :  { %v108_v51 = vsub.f32 %v48_v11, %v107_v49  ;;  %v98_v52 = vsel %vm97_vm3, %v744_v46, %v95_v50  ;;  %v260_v11 = vmul.f32 0.125, %v245_v10 }
 0x14c   :  { %100 = vst.msk [vmem:[#allocation8] sm:$0x3] %vm99_vm4, %v98_v52 }
 0x14d   :  { %670 = vmatmul.mubr.msk.f32.gmra.mrb[2].mxu0 %vm119_vm2, %v108_v51  ;;  %v266_v13 = vsub.f32 %v260_v11, %v263_v12  ;;  %v630_v11 = vld [vmem:[%s1054_s5] ss:$0 sm:$0xff] }
 0x14e   :  { %672 = vmatprep.mubr.msk.f32.mxu0 %vm863_vm1, %v864_v9 }
 0x14f   :  { %v269_v14 = vmax.f32 %v266_v13, 0.0 }
 0x151   :  { %673 = vmatmul.mubr.msk.f32.gmra.mrb[4].mxu0 %vm119_vm2, %v107_v49  ;;  %v275_v15 = vadd.f32 1e-05, %v269_v14 }
 0x153   :  { %745 = vrsqrt.f32 %v275_v15 }
 0x15d   :  { %v746_v17 = vpop.eup %745 }
 0x15e   :  { %v281_v18 = vmul.f32 %v746_v17, %v272_v16 }
 0x160   :  { %684 = vmatmul.mubr.msk.f32.vlgmr.msra.gmra.mrb[0].mxu1 %vm119_vm2, %v281_v18 }
 0x161   :  { %686 = vmatprep.mubr.msk.f32.mxu1 %vm863_vm1, %v864_v9 }
 0x220   :  { %v200_v19 = vpop.f32.mrb[2].mxu0 }
 0x221   :  { %v201_v20 = vadd.f32 %v626_v53, %v200_v19  ;;  %v671_v21 = vpop.f32.mrb[3].mxu0 }
 0x223   :  { %v210_v22 = vmax.f32 %v201_v20, 0.0 }
 0x224   :  { %v205_v23 = vpop.f32.mrb[4].mxu0 }
 0x225   :  { %v219_v24 = vsel %vm119_vm2, %v210_v22, 0.0  ;;  %v237_v25 = vmul.f32 %v210_v22, %v210_v22  ;;  %v206_v26 = vadd.f32 %v626_v53, %v205_v23  ;;  %v674_v27 = vpop.f32.mrb[5].mxu0 }
 0x226   :  { %v220_v28 = vrot.slane %v219_v24, 4 }
 0x227   :  { %v246_v29 = vsel %vm119_vm2, %v237_v25, 0.0  ;;  %v211_v30 = vmax.f32 %v206_v26, 0.0 }
 0x228   :  { %v221_v31 = vadd.f32 %v220_v28, %v219_v24  ;;  %v247_v32 = vrot.slane %v246_v29, 4 }
 0x229   :  { %v226_v33 = vsel %vm119_vm2, %v211_v30, 0.0  ;;  %v238_v34 = vmul.f32 %v211_v30, %v211_v30 }
 0x22a   :  { %v222_v35 = vrot.slane %v221_v31, 2  ;;  %v248_v36 = vadd.f32 %v247_v32, %v246_v29  ;;  %v227_v37 = vrot.slane %v226_v33, 4 }
 0x22b   :  { %v253_v38 = vsel %vm119_vm2, %v238_v34, 0.0 }
 0x22c   :  { %v223_v39 = vadd.f32 %v222_v35, %v221_v31  ;;  %v249_v40 = vrot.slane %v248_v36, 2  ;;  %v228_v41 = vadd.f32 %v227_v37, %v226_v33  ;;  %v254_v42 = vrot.slane %v253_v38, 4 }
 0x22e   :  { %v224_v43 = vrot.slane %v223_v39, 1  ;;  %v250_v44 = vadd.f32 %v249_v40, %v248_v36  ;;  %v229_v45 = vrot.slane %v228_v41, 2  ;;  %v255_v46 = vadd.f32 %v254_v42, %v253_v38  ;;  %v459_v40 = vld [vmem:[%s1055_s6] sm:$0xff] }
 0x230   :  { %v225_v47 = vadd.f32 %v224_v43, %v223_v39  ;;  %v251_v48 = vrot.slane %v250_v44, 1  ;;  %v230_v49 = vadd.f32 %v229_v45, %v228_v41  ;;  %v256_v50 = vrot.slane %v255_v46, 2  ;;  %v460_v41 = vld [vmem:[%s1055_s6 + $0x8] sm:$0xff]  ;;  %v461_v43 = vld [vmem:[%s1055_s6 + $0x10] sm:$0xff] }
 0x231   :  { %v715_v42 = vpack.c.bf16 %v460_v41, %v459_v40 }
 0x232   :  { %v234_v51 = vmul.f32 0.125, %v225_v47  ;;  %v252_v52 = vadd.f32 %v251_v48, %v250_v44  ;;  %v231_v53 = vrot.slane %v230_v49, 1  ;;  %v257_v54 = vadd.f32 %v256_v50, %v255_v46  ;;  %v462_v44 = vld [vmem:[%s1055_s6 + $0x18] sm:$0xff] }
 0x233   :  { %v369_v13 = vpop.f32.mrb[0].mxu1  ;;  %716 = vmatprep.subr.bf16.mxu0 %v715_v42  ;;  %v719_v45 = vpack.c.bf16 %v462_v44, %v461_v43 }
 0x234   :  { %v261_v55 = vmul.f32 0.125, %v252_v52  ;;  %v264_v56 = vmul.f32 %v234_v51, %v234_v51  ;;  %v232_v57 = vadd.f32 %v231_v53, %v230_v49  ;;  %v258_v58 = vrot.slane %v257_v54, 1  ;;  %v685_v15 = vpop.f32.mrb[1].mxu1  ;;  %718 = vmatpush3.bf16.msra.mxu0 %v715_v42 }
 0x235   :  { %v273_v5 = vsub.f32 %v210_v22, %v234_v51  ;;  %v370_v14 = vadd.f32 %v630_v11, %v369_v13  ;;  %720 = vmatprep.subr.bf16.mxu0 %v719_v45 }
 0x236   :  { %v267_v59 = vsub.f32 %v261_v55, %v264_v56  ;;  %v235_v60 = vmul.f32 0.125, %v232_v57  ;;  %v259_v61 = vadd.f32 %v258_v58, %v257_v54 }
 0x237   :  { %v383_v16 = vmax.f32 %v370_v14, 0.0 }
 0x238   :  { %v270_v62 = vmax.f32 %v267_v59, 0.0  ;;  %v265_v63 = vmul.f32 %v235_v60, %v235_v60  ;;  %v262_v0 = vmul.f32 0.125, %v259_v61  ;;  %v274_v8 = vsub.f32 %v211_v30, %v235_v60  ;;  %722 = vmatpush3.bf16.msra.mxu0 %v719_v45 }
 0x239   :  { %v386_v17 = vsel %vm119_vm2, %v383_v16, 0.0  ;;  %v410_v18 = vmul.f32 %v383_v16, %v383_v16 }
 0x23a   :  { %v276_v1 = vadd.f32 1e-05, %v270_v62  ;;  %v268_v2 = vsub.f32 %v262_v0, %v265_v63  ;;  %v387_v19 = vrot.slane %v386_v17, 4 }
 0x23b   :  { %v413_v20 = vsel %vm119_vm2, %v410_v18, 0.0 }
 0x23c   :  { %747 = vrsqrt.f32 %v276_v1  ;;  %v271_v3 = vmax.f32 %v268_v2, 0.0  ;;  %v388_v21 = vadd.f32 %v387_v19, %v386_v17 }
 0x23e   :  { %v277_v4 = vadd.f32 1e-05, %v271_v3  ;;  %v389_v22 = vrot.slane %v388_v21, 2 }
 0x240   :  { %749 = vrsqrt.f32 %v277_v4  ;;  %v390_v24 = vadd.f32 %v389_v22, %v388_v21 }
 0x242   :  { %v391_v26 = vrot.slane %v390_v24, 1 }
 0x244   :  { %v392_v28 = vadd.f32 %v391_v26, %v390_v24 }
 0x246   :  { %v748_v6 = vpop.eup %747  ;;  %v407_v30 = vmul.f32 0.125, %v392_v28 }
 0x247   :  { %v282_v7 = vmul.f32 %v748_v6, %v273_v5 }
 0x248   :  { %v437_v33 = vmul.f32 %v407_v30, %v407_v30  ;;  %v446_v37 = vsub.f32 %v383_v16, %v407_v30 }
 0x249   :  { %687 = vmatmul.mubr.msk.f32.gmra.mrb[2].mxu1 %vm119_vm2, %v282_v7 }
 0x24a   :  { %689 = vmatprep.mubr.msk.f32.mxu1 %vm863_vm1, %v864_v9  ;;  %v750_v10 = vpop.eup %749  ;;  %v414_v9 = vrot.slane %v413_v20, 4 }
 0x24b   :  { %v283_v12 = vmul.f32 %v750_v10, %v274_v8 }
 0x24c   :  { %v415_v23 = vadd.f32 %v414_v9, %v413_v20 }
 0x24d   :  { %690 = vmatmul.mubr.msk.f32.gmra.mrb[4].mxu1 %vm119_vm2, %v283_v12 }
 0x24e   :  { %v416_v25 = vrot.slane %v415_v23, 2 }
 0x250   :  { %v417_v27 = vadd.f32 %v416_v25, %v415_v23 }
 0x252   :  { %v418_v29 = vrot.slane %v417_v27, 1 }
 0x254   :  { %v419_v31 = vadd.f32 %v418_v29, %v417_v27 }
 0x256   :  { %v434_v32 = vmul.f32 0.125, %v419_v31 }
 0x258   :  { %v440_v34 = vsub.f32 %v434_v32, %v437_v33 }
 0x25a   :  { %v443_v35 = vmax.f32 %v440_v34, 0.0 }
 0x25c   :  { %v449_v36 = vadd.f32 1e-05, %v443_v35 }
 0x25e   :  { %751 = vrsqrt.f32 %v449_v36 }
 0x268   :  { %v752_v38 = vpop.eup %751 }
 0x269   :  { %v455_v39 = vmul.f32 %v752_v38, %v446_v37  ;;  %v634_v38 = vld [vmem:[%s1056_s7] ss:$0 sm:$0xff]  ;;  %s865_s7 = smov [#allocation5]  }
 0x26a   :  { %s588_s11 = sshll.u32 %s865_s7, 4  ;;  %s589_s11 = int_to_ptr.vmem [resolvable:$true] %s588_s11 }
 0x26b   :  { %700 = vmatprep.mubr.msk.f32.mxu0 %vm119_vm2, %v455_v39  ;;  %s787_s12 = scalar_lea.vmem %s589_s11, 128  ;;  %p792_p9 = scmp.lt.s32.totalorder %s589_s11, %s589_s11 }
 0x26c   :  { %p788_p8 = scmp.ne.s32.totalorder %s589_s11, %s787_s12  ;;  %p793_p10 = scmp.lt.s32.totalorder %s787_s12, %s787_s12 }
 0x26e   :  { %p794_p11 = por %p793_p10, %p792_p9 }
 0x270   :  { %p795_p12 = pnand %p794_p11, %p788_p8 }
 0x31c   :  { %v374_v46 = vpop.f32.mrb[2].mxu1 }
 0x31d   :  { %v375_v47 = vadd.f32 %v630_v11, %v374_v46  ;;  %v688_v48 = vpop.f32.mrb[3].mxu1 }
 0x31f   :  { %v384_v49 = vmax.f32 %v375_v47, 0.0 }
 0x320   :  { %v379_v52 = vpop.f32.mrb[4].mxu1 }
 0x321   :  { %v393_v50 = vsel %vm119_vm2, %v384_v49, 0.0  ;;  %v411_v51 = vmul.f32 %v384_v49, %v384_v49  ;;  %v380_v54 = vadd.f32 %v630_v11, %v379_v52  ;;  %v691_v55 = vpop.f32.mrb[5].mxu1 }
 0x322   :  { %v394_v53 = vrot.slane %v393_v50, 4 }
 0x323   :  { %v420_v56 = vsel %vm119_vm2, %v411_v51, 0.0  ;;  %v385_v59 = vmax.f32 %v380_v54, 0.0 }
 0x324   :  { %v395_v57 = vadd.f32 %v394_v53, %v393_v50  ;;  %v421_v58 = vrot.slane %v420_v56, 4 }
 0x325   :  { %v400_v62 = vsel %vm119_vm2, %v385_v59, 0.0  ;;  %v412_v63 = vmul.f32 %v385_v59, %v385_v59 }
 0x326   :  { %v396_v60 = vrot.slane %v395_v57, 2  ;;  %v422_v61 = vadd.f32 %v421_v58, %v420_v56  ;;  %v401_v0 = vrot.slane %v400_v62, 4 }
 0x327   :  { %v427_v3 = vsel %vm119_vm2, %v412_v63, 0.0 }
 0x328   :  { %v397_v1 = vadd.f32 %v396_v60, %v395_v57  ;;  %v423_v2 = vrot.slane %v422_v61, 2  ;;  %v402_v4 = vadd.f32 %v401_v0, %v400_v62  ;;  %v428_v5 = vrot.slane %v427_v3, 4 }
 0x32a   :  { %v398_v6 = vrot.slane %v397_v1, 1  ;;  %v424_v7 = vadd.f32 %v423_v2, %v422_v61  ;;  %v403_v8 = vrot.slane %v402_v4, 2  ;;  %v429_v10 = vadd.f32 %v428_v5, %v427_v3 }
 0x32c   :  { %v399_v11 = vadd.f32 %v398_v6, %v397_v1  ;;  %v425_v12 = vrot.slane %v424_v7, 1  ;;  %v404_v13 = vadd.f32 %v403_v8, %v402_v4  ;;  %v430_v14 = vrot.slane %v429_v10, 2 }
 0x32e   :  { %v408_v15 = vmul.f32 0.125, %v399_v11  ;;  %v426_v16 = vadd.f32 %v425_v12, %v424_v7  ;;  %v405_v17 = vrot.slane %v404_v13, 1  ;;  %v431_v18 = vadd.f32 %v430_v14, %v429_v10 }
 0x330   :  { %v435_v19 = vmul.f32 0.125, %v426_v16  ;;  %v438_v20 = vmul.f32 %v408_v15, %v408_v15  ;;  %v406_v21 = vadd.f32 %v405_v17, %v404_v13  ;;  %v432_v9 = vrot.slane %v431_v18, 1 }
 0x331   :  { %v447_v32 = vsub.f32 %v384_v49, %v408_v15 }
 0x332   :  { %v441_v22 = vsub.f32 %v435_v19, %v438_v20  ;;  %v409_v23 = vmul.f32 0.125, %v406_v21  ;;  %v433_v24 = vadd.f32 %v432_v9, %v431_v18 }
 0x334   :  { %v444_v25 = vmax.f32 %v441_v22, 0.0  ;;  %v436_v26 = vmul.f32 0.125, %v433_v24  ;;  %v439_v27 = vmul.f32 %v409_v23, %v409_v23  ;;  %v448_v35 = vsub.f32 %v385_v59, %v409_v23 }
 0x336   :  { %v450_v28 = vadd.f32 1e-05, %v444_v25  ;;  %v442_v29 = vsub.f32 %v436_v26, %v439_v27 }
 0x338   :  { %753 = vrsqrt.f32 %v450_v28  ;;  %v445_v30 = vmax.f32 %v442_v29, 0.0 }
 0x33a   :  { %v451_v31 = vadd.f32 1e-05, %v445_v30 }
 0x33c   :  { %755 = vrsqrt.f32 %v451_v31 }
 0x342   :  { %v754_v33 = vpop.eup %753 }
 0x343   :  { %v456_v34 = vmul.f32 %v754_v33, %v447_v32 }
 0x345   :  { %701 = vmatmul.mubr.msk.f32.vlgmr.msra.gmra.mrb[6].mxu0 %vm119_vm2, %v456_v34 }
 0x346   :  { %v756_v36 = vpop.eup %755 }
 0x347   :  { %v457_v37 = vmul.f32 %v756_v36, %v448_v35 }
 0x349   :  { %458 = vst.msk [vmem:[#allocation5] sm:$0xff] %vm119_vm2, %v457_v37 }
 0x418   :  { %v702_v39 = vpop.f32.mrb[6].mxu0 }
 0x419   :  { %v547_v40 = vadd.f32 %v702_v39, %v634_v38  ;;  %v541_v41 = vpop.f32.mrb[7].mxu0 }
 0x41a   :  { %v542_v42 = vadd.f32 %v634_v38, %v541_v41 }
 0x41b   :  { %v637_v46 = vmul.f32 -1.442695, %v547_v40 }
 0x41c   :  { %v551_v43 = vsel %vm550_vm5, %v542_v42, -inf }
 0x41d   :  { %552 = vmax.xlane.f32.xlu1 %v551_v43 }
 0x4aa   :  { %v553_v44 = vpop.xlane.xlu1 %552 }
 0x4ab   :  { %v554_v45 = vsub.f32 %v542_v42, %v553_v44 }
 0x4ad   :  { %v555_v47 = vmul.f32 1.442695, %v554_v45 }
 0x4af   :  { %757 = vpow2.f32 %v555_v47 }
 0x4b0   :  { %759 = vpow2.f32 %v637_v46 }
 0x4b9   :  { %v758_v48 = vpop.eup %757 }
 0x4ba   :  { %v760_v49 = vpop.eup %759  ;;  %v557_v50 = vsel %vm550_vm5, %v758_v48, 0.0 }
 0x4bb   :  { %558 = vadd.xlane.f32.xlu1 %v557_v50  ;;  %v565_v51 = vadd.f32 1.0, %v760_v49 }
 0x4bd   :  { %761 = vrcp.f32 %v565_v51 }
 0x4c7   :  { %v762_v52 = vpop.eup %761 }
 0x4cc   :  { %573 = vrot.lane.b32.xlu1 %v762_v52, %s861_s24 }
 0x548   :  { %v559_v53 = vpop.xlane.xlu1 %558 }
 0x549   :  { %763 = vrcp.f32 %v559_v53 }
 0x54a   :  { %798 = shalt.err (!%p795_p12)
}
 0x54b   :  { %s799_s1 = scalar_lea.hbm %s1057_s8, 128 }
 0x54c   :  { %p800_p13 = scmp.ne.s32.totalorder %s1057_s8, %s799_s1  ;;  %p803_p0 = scmp.lt.u32.totalorder %s799_s1, %s1057_s8 }
 0x54e   :  { %p805_p1 = pnand %p803_p0, %p800_p13 }
 0x550   :  { %808 = shalt.err (!%p805_p1)
}
 0x551   :  { %591 = dma.vmem_to_hbm [thread:$0]  %s589_s11, 128, %s1057_s8, [#allocation4]   ;;  %vm577_vm6 = vcmask 64512   ;;  %vm579_vm7 = vcmask 97280   ;;  %v574_v57 = vpop.permute.xlu1 %573 }
 0x552   :  { %s866_s17 = smov 4   ;;  %s867_s18 = smov [#allocation6]  }
 0x553   :  { %v764_v54 = vpop.eup %763  ;;  %s598_s19 = sshll.u32 %s867_s18, 4  ;;  %s868_s20 = smov [#allocation8]   ;;  %s599_s19 = int_to_ptr.vmem [resolvable:$true] %s598_s19 }
 0x554   :  { %v561_v55 = vmul.f32 %v764_v54, %v758_v48  ;;  %s608_s3 = sshll.u32 %s868_s20, 4  ;;  %s809_s8 = scalar_lea.vmem %s599_s19, 128  ;;  %s609_s3 = int_to_ptr.vmem [resolvable:$true] %s608_s3 }
 0x555   :  { %p810_p2 = scmp.ne.s32.totalorder %s599_s19, %s809_s8  ;;  %p814_p3 = scmp.lt.s32.totalorder %s599_s19, %s599_s19 }
 0x556   :  { %569 = vrot.lane.b32.xlu0 %v561_v55, %s866_s17  ;;  %p815_p4 = scmp.lt.s32.totalorder %s809_s8, %s809_s8 }
 0x558   :  { %p816_p5 = por %p815_p4, %p814_p3 }
 0x55a   :  { %p817_p6 = pnand %p816_p5, %p810_p2 }
 0x5c8   :  { %v570_v56 = vpop.permute.xlu0 %569 }
 0x5c9   :  { %v576_v58 = vsel %vm550_vm5, %v542_v42, %v570_v56 }
 0x5ca   :  { %v578_v59 = vsel %vm577_vm6, %v576_v58, %v574_v57 }
 0x5cb   :  { %v580_v60 = vsel %vm579_vm7, %v578_v59, 0.0 }
 0x5cc   :  { %581 = vst [vmem:[#allocation6] sm:$0xff] %v580_v60 }
 0x5cd   :  { %820 = shalt.err (!%p817_p6)
}
 0x5ce   :  { %s821_s22 = scalar_lea.hbm %s1058_s9, 128 }
 0x5cf   :  { %p822_p7 = scmp.ne.s32.totalorder %s1058_s9, %s821_s22  ;;  %p825_p8 = scmp.lt.u32.totalorder %s821_s22, %s1058_s9 }
 0x5d1   :  { %p827_p9 = pnand %p825_p8, %p822_p7 }
 0x5d3   :  { %830 = shalt.err (!%p827_p9)
}
 0x5d4   :  { %601 = dma.vmem_to_hbm [thread:$0]  %s599_s19, 128, %s1058_s9, [#allocation7]  }
 0x5d5   :  { %s831_s6 = scalar_lea.vmem %s609_s3, 32  ;;  %p836_p11 = scmp.lt.s32.totalorder %s609_s3, %s609_s3 }
 0x5d6   :  { %p832_p10 = scmp.ne.s32.totalorder %s609_s3, %s831_s6  ;;  %p837_p12 = scmp.lt.s32.totalorder %s831_s6, %s831_s6 }
 0x5d8   :  { %p838_p13 = por %p837_p12, %p836_p11 }
 0x5da   :  { %p839_p0 = pnand %p838_p13, %p832_p10 }
 0x5dc   :  { %842 = shalt.err (!%p839_p0)
}
 0x5dd   :  { %s843_s11 = scalar_lea.hbm %s1059_s10, 32 }
 0x5de   :  { %p844_p1 = scmp.ne.s32.totalorder %s1059_s10, %s843_s11  ;;  %p847_p2 = scmp.lt.u32.totalorder %s843_s11, %s1059_s10 }
 0x5e0   :  { %p849_p3 = pnand %p847_p2, %p844_p1 }
 0x5e2   :  { %852 = shalt.err (!%p849_p3)
}
 0x5e3   :  { %611 = dma.vmem_to_hbm [thread:$0]  %s609_s3, 32, %s1059_s10, [#allocation7]  }
 0x5e4   :  { %855 = dma.done.wait [#allocation4], 128  }
 0x5e5   :  { %856 = vsyncadd [#allocation4], 4294967168 }
 0x5e6   :  { %857 = dma.done.wait [#allocation7], 160  }
 0x5e7   :  { %858 = vsyncadd [#allocation7], 4294967136 }
 0x5e8   :  { %621 = vsyncpa [#allocation3], 1 }
 0x5e9   :  { %622 = vsyncpa [#allocation4], 1 }
 0x5ea   :  { %623 = vsyncpa [#allocation7], 1 }

</bundles_post_ra>
